<compile_context>
chip_gen: v5e
topology: v5e:2x2
jax: 0.10.0
libtpu: 0.0.40
codegen_flags: <defaults>
</compile_context>

<pallas_src>
import functools

import jax
import jax.numpy as jnp
from jax.experimental import pallas as pl
from jax.experimental.pallas import tpu as pltpu


def _round_up(x: int, m: int) -> int:
    return ((x + m - 1) // m) * m


def _choose_batch_tile(batch: int):
    """Pick (tile_b, b_pad, num_tiles) for the batch grid axis."""
    if batch <= 256:
        # Single tile; the kernel is latency/launch bound at these sizes.
        tile_b = _round_up(batch, 8)
    else:
        # Large batch: big tiles (up to 1024 rows) amortize the ~0.35us
        # per-grid-step overhead, but always keep >= 2 tiles so the
        # "parallel" axis shards across both TensorCores on v7x.
        half = _round_up((batch + 1) // 2, 8)
        tile_b = min(1024, half)
    b_pad = _round_up(batch, tile_b)
    return tile_b, b_pad, b_pad // tile_b


def _actor_kernel(x_ref, w1_ref, w2_ref, w3_ref, b_ref, o_ref, *, max_action):
    """One batch tile of the fused 3-layer MLP.

    x_ref  : (tile_b, k_pad)  bf16
    w1_ref : (k_pad, h_pad)   bf16
    w2_ref : (h_pad, h_pad)   bf16
    w3_ref : (h_pad, n_pad)   bf16
    b_ref  : (3, max(h_pad, n_pad)) f32  -- packed [b1; b2; b3]
    o_ref  : (tile_b, n_pad)  bf16
    """
    h_pad = w1_ref.shape[1]
    n_pad = w3_ref.shape[1]

    b1 = b_ref[0:1, :h_pad]
    b2 = b_ref[1:2, :h_pad]
    b3 = b_ref[2:3, :n_pad]

    # Layer 1: Linear + ReLU (bf16 MXU pass, f32 accumulation)
    h1 = jnp.dot(x_ref[...], w1_ref[...], preferred_element_type=jnp.float32) + b1
    h1 = jnp.maximum(h1, 0.0).astype(jnp.bfloat16)
    # Layer 2: Linear + ReLU
    h2 = jnp.dot(h1, w2_ref[...], preferred_element_type=jnp.float32) + b2
    h2 = jnp.maximum(h2, 0.0).astype(jnp.bfloat16)
    # Layer 3: Linear + Tanh, scaled by max_action (computed in f32, stored bf16)
    y = jnp.dot(h2, w3_ref[...], preferred_element_type=jnp.float32) + b3
    o_ref[...] = (max_action * jnp.tanh(y)).astype(o_ref.dtype)


class PreparedActorParams:
    """Kernel-ready (zero-padded, bf16) Actor parameters.

    Build once with prepare_actor_params() and reuse for every forward call so
    the padding / f32->bf16 casts are not re-executed per step.
    """

    def __init__(self, w1, w2, w3, bias, *, state_dim, hidden, action_dim, max_action):
        self.w1, self.w2, self.w3, self.bias = w1, w2, w3, bias
        self.state_dim = int(state_dim)
        self.hidden = int(hidden)
        self.action_dim = int(action_dim)
        self.max_action = float(max_action)
        self.k_pad = w1.shape[0]
        self.h_pad = w1.shape[1]
        self.n_pad = w3.shape[1]
        self.bias_cols = bias.shape[1]


def prepare_actor_params(params, *, max_action=1.0) -> PreparedActorParams:
    """One-time preparation: pad to (8,128)-aligned shapes, cast weights to bf16,
    and pack the three biases into a single (3, C) f32 buffer (one DMA)."""
    w1, b1 = params["w1"], params["b1"]
    w2, b2 = params["w2"], params["b2"]
    w3, b3 = params["w3"], params["b3"]

    state_dim, hidden = w1.shape
    action_dim = w3.shape[1]

    k_pad = _round_up(state_dim, 128)
    h_pad = _round_up(hidden, 128)
    n_pad = _round_up(action_dim, 128)

    bf16 = jnp.bfloat16
    w1_p = jnp.zeros((k_pad, h_pad), bf16).at[:state_dim, :hidden].set(w1.astype(bf16))
    w2_p = jnp.zeros((h_pad, h_pad), bf16).at[:hidden, :hidden].set(w2.astype(bf16))
    w3_p = jnp.zeros((h_pad, n_pad), bf16).at[:hidden, :action_dim].set(w3.astype(bf16))

    bias_cols = max(h_pad, n_pad)
    bias = jnp.zeros((3, bias_cols), jnp.float32)
    bias = bias.at[0, :hidden].set(b1.reshape(-1))
    bias = bias.at[1, :hidden].set(b2.reshape(-1))
    bias = bias.at[2, :action_dim].set(b3.reshape(-1))

    return PreparedActorParams(
        w1_p, w2_p, w3_p, bias,
        state_dim=state_dim, hidden=hidden, action_dim=action_dim,
        max_action=max_action)


def actor_forward(state, prepared: PreparedActorParams):
    """state: (B, state_dim) f32.  Returns (B, action_dim) f32."""
    B, state_dim = state.shape
    assert state_dim == prepared.state_dim, "state_dim mismatch with prepared params"

    k_pad, h_pad, n_pad = prepared.k_pad, prepared.h_pad, prepared.n_pad
    tile_b, b_pad, num_tiles = _choose_batch_tile(B)

    # Only per-call data prep: pad/cast the state (small: B x 128 bf16).
    x_p = jnp.zeros((b_pad, k_pad), jnp.bfloat16)
    x_p = x_p.at[:B, :state_dim].set(state.astype(jnp.bfloat16))

    flops = 2 * b_pad * (k_pad * h_pad + h_pad * h_pad + h_pad * n_pad)
    bytes_accessed = (
        x_p.size * 2
        + prepared.w1.size * 2 + prepared.w2.size * 2 + prepared.w3.size * 2
        + prepared.bias.size * 4
        + b_pad * n_pad * 2)
    cost = pl.CostEstimate(flops=flops,
                           transcendentals=b_pad * n_pad,
                           bytes_accessed=bytes_accessed)

    kernel = functools.partial(_actor_kernel, max_action=prepared.max_action)
    out_pad = pl.pallas_call(
        kernel,
        out_shape=jax.ShapeDtypeStruct((b_pad, n_pad), jnp.bfloat16),
        grid=(num_tiles,),
        in_specs=[
            pl.BlockSpec((tile_b, k_pad), lambda i: (i, 0)),        # x: tiled over batch
            pl.BlockSpec((k_pad, h_pad), lambda i: (0, 0)),         # w1: resident
            pl.BlockSpec((h_pad, h_pad), lambda i: (0, 0)),         # w2: resident
            pl.BlockSpec((h_pad, n_pad), lambda i: (0, 0)),         # w3: resident
            pl.BlockSpec((3, prepared.bias_cols), lambda i: (0, 0)),  # packed biases
        ],
        out_specs=pl.BlockSpec((tile_b, n_pad), lambda i: (i, 0)),
        compiler_params=pltpu.CompilerParams(
            dimension_semantics=("parallel",),
        ),
        cost_estimate=cost,
    )(x_p, prepared.w1, prepared.w2, prepared.w3, prepared.bias)

    # Slice off padding, restore f32 interface.
    return out_pad[:B, :prepared.action_dim].astype(jnp.float32)


def init_actor_params(key, state_dim, action_dim, hidden_dim=256):
    """Mimics PyTorch nn.Linear default init: U(-1/sqrt(fan_in), 1/sqrt(fan_in))."""
    def linear(k, fan_in, fan_out):
        kw, kb = jax.random.split(k)
        bound = 1.0 / jnp.sqrt(jnp.float32(fan_in))
        w = jax.random.uniform(kw, (fan_in, fan_out), jnp.float32, -bound, bound)
        b = jax.random.uniform(kb, (1, fan_out), jnp.float32, -bound, bound)
        return w, b

    k1, k2, k3 = jax.random.split(key, 3)
    w1, b1 = linear(k1, state_dim, hidden_dim)
    w2, b2 = linear(k2, hidden_dim, hidden_dim)
    w3, b3 = linear(k3, hidden_dim, action_dim)
    return {"w1": w1, "b1": b1, "w2": w2, "b2": b2, "w3": w3, "b3": b3}


def actor_forward_ref_f32(state, params, *, max_action=1.0):
    h1 = jnp.maximum(state @ params["w1"] + params["b1"], 0.0)
    h2 = jnp.maximum(h1 @ params["w2"] + params["b2"], 0.0)
    return max_action * jnp.tanh(h2 @ params["w3"] + params["b3"])


def actor_forward_ref_bf16(state, params, *, max_action=1.0):
    """Pure-JAX reference following the same bf16-operand / f32-accum path."""
    bf16 = jnp.bfloat16
    f32 = jnp.float32
    w1, w2, w3 = (params[k].astype(bf16) for k in ("w1", "w2", "w3"))
    h1 = jnp.dot(state.astype(bf16), w1, preferred_element_type=f32) + params["b1"]
    h1 = jnp.maximum(h1, 0.0).astype(bf16)
    h2 = jnp.dot(h1, w2, preferred_element_type=f32) + params["b2"]
    h2 = jnp.maximum(h2, 0.0).astype(bf16)
    y = jnp.dot(h2, w3, preferred_element_type=f32) + params["b3"]
    return max_action * jnp.tanh(y)


if __name__ == "__main__":
    # BipedalWalker-like dims, small batch.
    B, state_dim, action_dim, hidden_dim = 8, 24, 4, 256
    max_action = 1.0

    key = jax.random.PRNGKey(0)
    k_params, k_state, k_big = jax.random.split(key, 3)
    params = init_actor_params(k_params, state_dim, action_dim, hidden_dim)
    state = jax.random.normal(k_state, (B, state_dim), jnp.float32)

    # One-time parameter preparation (padding + bf16 cast hoisted off the hot path).
    prepared = prepare_actor_params(params, max_action=max_action)
    fwd = jax.jit(lambda s: actor_forward(s, prepared))

    # --- Small (acting) batch -------------------------------------------------
    out = jax.block_until_ready(fwd(state))
    assert out.shape == (B, action_dim)

    ref_bf16 = actor_forward_ref_bf16(state, params, max_action=max_action)
    ref_f32 = actor_forward_ref_f32(state, params, max_action=max_action)
    assert jnp.allclose(out, ref_bf16, atol=1e-2, rtol=1e-2), "mismatch vs bf16 reference"
    assert jnp.allclose(out, ref_f32, atol=2.5e-2, rtol=2.5e-2), "mismatch vs f32 reference"

    # --- Larger (training-sized) batch: exercises the multi-tile parallel grid.
    B_big = 512
    state_big = jax.random.normal(k_big, (B_big, state_dim), jnp.float32)
    out_big = jax.block_until_ready(fwd(state_big))
    assert out_big.shape == (B_big, action_dim)
    ref_big = actor_forward_ref_bf16(state_big, params, max_action=max_action)
    assert jnp.allclose(out_big, ref_big, atol=1e-2, rtol=1e-2), "mismatch (large batch)"

    print("KERNEL_OK")
</pallas_src>

<mosaic_0001>
module attributes {stable_mosaic.version = 11 : i64} {
  func.func @_actor_kernel(%arg0: i32, %arg1: memref<8x128xbf16, #tpu.memory_space<vmem>>, %arg2: memref<128x256xbf16, #tpu.memory_space<vmem>>, %arg3: memref<256x256xbf16, #tpu.memory_space<vmem>>, %arg4: memref<256x128xbf16, #tpu.memory_space<vmem>>, %arg5: memref<3x256xf32, #tpu.memory_space<vmem>>, %arg6: memref<8x128xbf16, #tpu.memory_space<vmem>>) attributes {dimension_semantics = [#tpu.dimension_semantics<parallel>], iteration_bounds = array<i64: 1>, scalar_prefetch = 0 : i64, scratch_operands = 0 : i64, tpu.core_type = #tpu.core_type<tc>, window_params = [{transform_indices = @transform_0, window_bounds = array<i64: 8, 128>}, {pipeline_mode = #tpu.pipeline_mode<synchronous>, transform_indices = @transform_1, window_bounds = array<i64: 128, 256>}, {pipeline_mode = #tpu.pipeline_mode<synchronous>, transform_indices = @transform_2, window_bounds = array<i64: 256, 256>}, {pipeline_mode = #tpu.pipeline_mode<synchronous>, transform_indices = @transform_3, window_bounds = array<i64: 256, 128>}, {pipeline_mode = #tpu.pipeline_mode<synchronous>, transform_indices = @transform_4, window_bounds = array<i64: 3, 256>}, {transform_indices = @transform_5, window_bounds = array<i64: 8, 128>}]} {
    %c0 = arith.constant 0 : index
    %c0_0 = arith.constant 0 : index
    %0 = vector.load %arg5[%c0, %c0_0] : memref<3x256xf32, #tpu.memory_space<vmem>>, vector<1x256xf32>
    %c1 = arith.constant 1 : index
    %c0_1 = arith.constant 0 : index
    %1 = vector.load %arg5[%c1, %c0_1] : memref<3x256xf32, #tpu.memory_space<vmem>>, vector<1x256xf32>
    %c2 = arith.constant 2 : index
    %c0_2 = arith.constant 0 : index
    %2 = vector.load %arg5[%c2, %c0_2] : memref<3x256xf32, #tpu.memory_space<vmem>>, vector<1x128xf32>
    %c0_3 = arith.constant 0 : index
    %c0_4 = arith.constant 0 : index
    %3 = vector.load %arg1[%c0_3, %c0_4] : memref<8x128xbf16, #tpu.memory_space<vmem>>, vector<8x128xbf16>
    %c0_5 = arith.constant 0 : index
    %c0_6 = arith.constant 0 : index
    %4 = vector.load %arg2[%c0_5, %c0_6] : memref<128x256xbf16, #tpu.memory_space<vmem>>, vector<128x256xbf16>
    %cst = arith.constant dense<0.000000e+00> : vector<8x256xf32>
    %5 = tpu.matmul %3, %4, %cst {dimension_numbers = #tpu.dot_dimension_numbers<[1], [0], [0], [1], [0, 0, 1, 1], [], []>} : vector<8x128xbf16>, vector<128x256xbf16>, vector<8x256xf32> -> vector<8x256xf32>
    %6 = vector.broadcast %0 : vector<1x256xf32> to vector<8x256xf32>
    %7 = arith.addf %5, %6 : vector<8x256xf32>
    %cst_7 = arith.constant 0.000000e+00 : f32
    %8 = vector.broadcast %cst_7 : f32 to vector<8x256xf32>
    %9 = arith.maximumf %7, %8 : vector<8x256xf32>
    %10 = arith.truncf %9 : vector<8x256xf32> to vector<8x256xbf16>
    %c0_8 = arith.constant 0 : index
    %c0_9 = arith.constant 0 : index
    %11 = vector.load %arg3[%c0_8, %c0_9] : memref<256x256xbf16, #tpu.memory_space<vmem>>, vector<256x256xbf16>
    %cst_10 = arith.constant dense<0.000000e+00> : vector<8x256xf32>
    %12 = tpu.matmul %10, %11, %cst_10 {dimension_numbers = #tpu.dot_dimension_numbers<[1], [0], [0], [1], [0, 0, 1, 1], [], []>} : vector<8x256xbf16>, vector<256x256xbf16>, vector<8x256xf32> -> vector<8x256xf32>
    %13 = vector.broadcast %1 : vector<1x256xf32> to vector<8x256xf32>
    %14 = arith.addf %12, %13 : vector<8x256xf32>
    %cst_11 = arith.constant 0.000000e+00 : f32
    %15 = vector.broadcast %cst_11 : f32 to vector<8x256xf32>
    %16 = arith.maximumf %14, %15 : vector<8x256xf32>
    %17 = arith.truncf %16 : vector<8x256xf32> to vector<8x256xbf16>
    %c0_12 = arith.constant 0 : index
    %c0_13 = arith.constant 0 : index
    %18 = vector.load %arg4[%c0_12, %c0_13] : memref<256x128xbf16, #tpu.memory_space<vmem>>, vector<256x128xbf16>
    %cst_14 = arith.constant dense<0.000000e+00> : vector<8x128xf32>
    %19 = tpu.matmul %17, %18, %cst_14 {dimension_numbers = #tpu.dot_dimension_numbers<[1], [0], [0], [1], [0, 0, 1, 1], [], []>} : vector<8x256xbf16>, vector<256x128xbf16>, vector<8x128xf32> -> vector<8x128xf32>
    %20 = vector.broadcast %2 : vector<1x128xf32> to vector<8x128xf32>
    %21 = arith.addf %19, %20 : vector<8x128xf32>
    %22 = math.tanh %21 : vector<8x128xf32>
    %cst_15 = arith.constant 1.000000e+00 : f32
    %23 = vector.broadcast %cst_15 : f32 to vector<8x128xf32>
    %24 = arith.mulf %23, %22 : vector<8x128xf32>
    %25 = arith.truncf %24 : vector<8x128xf32> to vector<8x128xbf16>
    %c0_16 = arith.constant 0 : index
    %c0_17 = arith.constant 0 : index
    %26 = vector.load %arg6[%c0_16, %c0_17] : memref<8x128xbf16, #tpu.memory_space<vmem>>, vector<8x128xbf16>
    tpu.vector_store %arg6[%c0_16, %c0_17], %25 {strides = array<i32>} : memref<8x128xbf16, #tpu.memory_space<vmem>>, vector<8x128xbf16>,
    return
  }
  func.func @transform_0(%arg0: i32) -> (i32, i32) {
    %c0_i32 = arith.constant 0 : i32
    %c0_i32_0 = arith.constant 0 : i32
    return %arg0, %c0_i32 : i32, i32
  }
  func.func @transform_1(%arg0: i32) -> (i32, i32) {
    %c0_i32 = arith.constant 0 : i32
    %c0_i32_0 = arith.constant 0 : i32
    %c0_i32_1 = arith.constant 0 : i32
    return %c0_i32, %c0_i32_0 : i32, i32
  }
  func.func @transform_2(%arg0: i32) -> (i32, i32) {
    %c0_i32 = arith.constant 0 : i32
    %c0_i32_0 = arith.constant 0 : i32
    %c0_i32_1 = arith.constant 0 : i32
    return %c0_i32, %c0_i32_0 : i32, i32
  }
  func.func @transform_3(%arg0: i32) -> (i32, i32) {
    %c0_i32 = arith.constant 0 : i32
    %c0_i32_0 = arith.constant 0 : i32
    %c0_i32_1 = arith.constant 0 : i32
    return %c0_i32, %c0_i32_0 : i32, i32
  }
  func.func @transform_4(%arg0: i32) -> (i32, i32) {
    %c0_i32 = arith.constant 0 : i32
    %c0_i32_0 = arith.constant 0 : i32
    %c0_i32_1 = arith.constant 0 : i32
    return %c0_i32, %c0_i32_0 : i32, i32
  }
  func.func @transform_5(%arg0: i32) -> (i32, i32) {
    %c0_i32 = arith.constant 0 : i32
    %c0_i32_0 = arith.constant 0 : i32
    return %arg0, %c0_i32 : i32, i32
  }
}

</mosaic_0001>

<bundles_post_ra>
// kernel: _lambda_.1
= control target key start
LH: loop header
LB: loop body
LE: loop exit
PB: predicated region body
PF: predicated region fallthrough
CT: control target
= control target key end

     0   :  { %10 = vsyncpa [#allocation3], 0  ;;  %s1088_s0 = inlined_call_operand.vmem [shape: bf16[8,128], index: 0, kind: input, shape index: {}]   ;;  %s1089_s1 = inlined_call_operand.hbm [shape: bf16[128,256], index: 1, kind: input, shape index: {}]   ;;  %s1090_s2 = inlined_call_operand.hbm [shape: bf16[256,256], index: 2, kind: input, shape index: {}]   ;;  %s1091_s3 = inlined_call_operand.hbm [shape: bf16[256,128], index: 3, kind: input, shape index: {}]   ;;  %s1092_s4 = inlined_call_operand.vmem [shape: f32[3,256], index: 4, kind: input, shape index: {}]   ;;  %s1093_s5 = inlined_call_operand.vmem [shape: bf16[8,128], index: 5, kind: output, shape index: {}]  }
   0x1   :  { %11 = vsyncpa [#allocation5], 0  ;;  %s31_s20 = sshll.u32 %s1090_s2, 4  ;;  %s1027_s21 = smov [#allocation4]   ;;  %s32_s20 = int_to_ptr.hbm [resolvable:$true] %s31_s20 }
   0x2   :  { %s33_s22 = sshll.u32 %s1027_s21, 4  ;;  %s18_s25 = sshll.u32 %s1089_s1, 4  ;;  %s34_s22 = int_to_ptr.vmem [resolvable:$true] %s33_s22  ;;  %s19_s25 = int_to_ptr.hbm [resolvable:$true] %s18_s25 }
   0x3   :  { %s1028_s26 = smov 128   ;;  %s1029_s27 = smov 8  }
   0x4   :  { %39 = dma.hbm_to_vmem [thread:$0]  %s32_s20, 4096, %s34_s22, [#allocation5], %s1028_s26, %s1028_s26, %s1029_s27  }
   0x5   :  { %s1030_s28 = smov [#allocation2]   ;;  %s44_s7 = sshll.u32 %s1091_s3, 4  ;;  %s45_s7 = int_to_ptr.hbm [resolvable:$true] %s44_s7 }
   0x6   :  { %s20_s29 = sshll.u32 %s1030_s28, 4  ;;  %s1031_s2 = smov [#allocation6]   ;;  %s21_s29 = int_to_ptr.vmem [resolvable:$true] %s20_s29 }
   0x7   :  { %26 = dma.hbm_to_vmem [thread:$0]  %s19_s25, 2048, %s21_s29, [#allocation3], %s1028_s26, %s1028_s26, %s1029_s27  }
   0x8   :  { %s46_s8 = sshll.u32 %s1031_s2, 4  ;;  %s1032_s9 = smov 64   ;;  %s47_s8 = int_to_ptr.vmem [resolvable:$true] %s46_s8 }
   0x9   :  { %s1033_s10 = smov 4  }
   0xa   :  { %52 = dma.hbm_to_vmem [thread:$0]  %s45_s7, 2048, %s47_s8, [#allocation5], %s1032_s9, %s1032_s9, %s1033_s10  }
   0xb   :  { %1023 = dma.done.wait [#allocation3], 2048  }
   0xc   :  { %1024 = vsyncadd [#allocation3], 4294965248 }
   0xd   :  { %1025 = dma.done.wait [#allocation5], 6144  }
   0xe   :  { %1026 = vsyncadd [#allocation5], 4294961152  ;;  %v679_v0 = vld [vmem:[#allocation2 + $0x70] sm:$0xf]  ;;  %v892_v1 = vld [vmem:[#allocation2 + $0x74] sm:$0xf0] }
   0xf   :  { %v891_v2 = vld [vmem:[#allocation2 + $0x74] sm:$0xf]  ;;  %v680_v3 = vor.u32 %v892_v1, %v679_v0  ;;  %v681_v4 = vld [vmem:[#allocation2 + $0x78] sm:$0xf0]  ;;  %v671_v5 = vld [vmem:[#allocation2 + $0x60] sm:$0xf] }
  0x10   :  { %v890_v6 = vld [vmem:[#allocation2 + $0x64] sm:$0xf0]  ;;  %v684_v7 = vor.u32 %v891_v2, %v681_v4  ;;  %v889_v8 = vld [vmem:[#allocation2 + $0x64] sm:$0xf]  ;;  %v673_v9 = vld [vmem:[#allocation2 + $0x68] sm:$0xf0] }
  0x11   :  { %173 = vmatpush.bf16.msra.mxu0 %v680_v3  ;;  %v672_v10 = vor.u32 %v890_v6, %v671_v5  ;;  %v676_v11 = vor.u32 %v889_v8, %v673_v9  ;;  %v663_v12 = vld [vmem:[#allocation2 + $0x50] sm:$0xf]  ;;  %v888_v13 = vld [vmem:[#allocation2 + $0x54] sm:$0xf0]  ;;  %v887_v14 = vld [vmem:[#allocation2 + $0x54] sm:$0xf] }
  0x12   :  { %186 = vmatpush.bf16.msra.mxu1 %v684_v7  ;;  %v665_v15 = vld [vmem:[#allocation2 + $0x58] sm:$0xf0]  ;;  %v664_v16 = vor.u32 %v888_v13, %v663_v12  ;;  %v655_v18 = vld [vmem:[#allocation2 + $0x40] sm:$0xf]  ;;  %v886_v19 = vld [vmem:[#allocation2 + $0x44] sm:$0xf0] }
  0x13   :  { %v668_v17 = vor.u32 %v887_v14, %v665_v15  ;;  %v885_v20 = vld [vmem:[#allocation2 + $0x44] sm:$0xf]  ;;  %v657_v21 = vld [vmem:[#allocation2 + $0x48] sm:$0xf0]  ;;  %v656_v22 = vor.u32 %v886_v19, %v655_v18  ;;  %v743_v23 = vld [vmem:[#allocation4 + $0x70] sm:$0xf] }
  0x14   :  { %v908_v24 = vld [vmem:[#allocation4 + $0x74] sm:$0xf0]  ;;  %v807_v25 = vld [vmem:[#allocation4 + $0xf0] sm:$0xf]  ;;  %v660_v26 = vor.u32 %v885_v20, %v657_v21  ;;  %v883_v31 = vld [vmem:[#allocation2 + $0x34] sm:$0xf] }
  0x15   :  { %174 = vmatpush.bf16.msra.mxu0 %v672_v10  ;;  %v647_v27 = vld [vmem:[#allocation2 + $0x30] sm:$0xf]  ;;  %v884_v28 = vld [vmem:[#allocation2 + $0x34] sm:$0xf0]  ;;  %v744_v29 = vor.u32 %v908_v24, %v743_v23  ;;  %v649_v32 = vld [vmem:[#allocation2 + $0x38] sm:$0xf0] }
  0x16   :  { %187 = vmatpush.bf16.msra.mxu1 %v676_v11  ;;  %v924_v30 = vld [vmem:[#allocation4 + $0xf4] sm:$0xf0]  ;;  %v735_v34 = vld [vmem:[#allocation4 + $0x60] sm:$0xf]  ;;  %v906_v35 = vld [vmem:[#allocation4 + $0x64] sm:$0xf0]  ;;  %v648_v38 = vor.u32 %v884_v28, %v647_v27  ;;  %v652_v43 = vor.u32 %v883_v31, %v649_v32 }
  0x17   :  { %v808_v33 = vor.u32 %v924_v30, %v807_v25  ;;  %400 = vmatpush.bf16.msra.mxu2 %v744_v29  ;;  %v799_v36 = vld [vmem:[#allocation4 + $0xe0] sm:$0xf]  ;;  %v922_v37 = vld [vmem:[#allocation4 + $0xe4] sm:$0xf0]  ;;  %v736_v41 = vor.u32 %v906_v35, %v735_v34  ;;  %v881_v44 = vld [vmem:[#allocation2 + $0x24] sm:$0xf] }
  0x18   :  { %v639_v39 = vld [vmem:[#allocation2 + $0x20] sm:$0xf]  ;;  %v882_v40 = vld [vmem:[#allocation2 + $0x24] sm:$0xf0]  ;;  %v800_v42 = vor.u32 %v922_v37, %v799_v36  ;;  %v727_v45 = vld [vmem:[#allocation4 + $0x50] sm:$0xf] }
  0x19   :  { %175 = vmatpush.bf16.msra.mxu0 %v664_v16  ;;  %413 = vmatpush.bf16.msra.mxu3 %v808_v33  ;;  %v904_v46 = vld [vmem:[#allocation4 + $0x54] sm:$0xf0]  ;;  %v641_v47 = vld [vmem:[#allocation2 + $0x28] sm:$0xf0]  ;;  %v791_v48 = vld [vmem:[#allocation4 + $0xd0] sm:$0xf]  ;;  %v640_v51 = vor.u32 %v882_v40, %v639_v39 }
  0x1a   :  { %188 = vmatpush.bf16.msra.mxu1 %v668_v17  ;;  %v920_v49 = vld [vmem:[#allocation4 + $0xd4] sm:$0xf0]  ;;  %v728_v50 = vor.u32 %v904_v46, %v727_v45  ;;  %v631_v52 = vld [vmem:[#allocation2 + $0x10] sm:$0xf]  ;;  %v719_v54 = vld [vmem:[#allocation4 + $0x40] sm:$0xf]  ;;  %v644_v56 = vor.u32 %v881_v44, %v641_v47 }
  0x1b   :  { %401 = vmatpush.bf16.msra.mxu2 %v736_v41  ;;  %v792_v53 = vor.u32 %v920_v49, %v791_v48  ;;  %v902_v55 = vld [vmem:[#allocation4 + $0x44] sm:$0xf0]  ;;  %v880_v57 = vld [vmem:[#allocation2 + $0x14] sm:$0xf0]  ;;  %v783_v58 = vld [vmem:[#allocation4 + $0xc0] sm:$0xf] }
  0x1c   :  { %v918_v59 = vld [vmem:[#allocation4 + $0xc4] sm:$0xf0]  ;;  %v879_v60 = vld [vmem:[#allocation2 + $0x14] sm:$0xf]  ;;  %v633_v61 = vld [vmem:[#allocation2 + $0x18] sm:$0xf0]  ;;  %v720_v63 = vor.u32 %v902_v55, %v719_v54  ;;  %v632_v0 = vor.u32 %v880_v57, %v631_v52 }
  0x1d   :  { %176 = vmatpush.bf16.msra.mxu0 %v656_v22  ;;  %414 = vmatpush.bf16.msra.mxu3 %v800_v42  ;;  %v623_v62 = vld [vmem:[#allocation2] sm:$0xf]  ;;  %v878_v1 = vld [vmem:[#allocation2 + $0x4] sm:$0xf0]  ;;  %v784_v2 = vor.u32 %v918_v59, %v783_v58  ;;  %v711_v3 = vld [vmem:[#allocation4 + $0x30] sm:$0xf]  ;;  %v636_v5 = vor.u32 %v879_v60, %v633_v61 }
  0x1e   :  { %189 = vmatpush.bf16.msra.mxu1 %v660_v26  ;;  %v900_v4 = vld [vmem:[#allocation4 + $0x34] sm:$0xf0]  ;;  %v877_v6 = vld [vmem:[#allocation2 + $0x4] sm:$0xf]  ;;  %v775_v7 = vld [vmem:[#allocation4 + $0xb0] sm:$0xf]  ;;  %v624_v15 = vor.u32 %v878_v1, %v623_v62 }
  0x1f   :  { %402 = vmatpush.bf16.msra.mxu2 %v728_v50  ;;  %v916_v8 = vld [vmem:[#allocation4 + $0xb4] sm:$0xf0]  ;;  %v625_v9 = vld [vmem:[#allocation2 + $0x8] sm:$0xf0]  ;;  %v907_v10 = vld [vmem:[#allocation4 + $0x74] sm:$0xf]  ;;  %v712_v14 = vor.u32 %v900_v4, %v711_v3 }
  0x20   :  { %v745_v11 = vld [vmem:[#allocation4 + $0x78] sm:$0xf0]  ;;  %v923_v12 = vld [vmem:[#allocation4 + $0xf4] sm:$0xf]  ;;  %v776_v16 = vor.u32 %v916_v8, %v775_v7  ;;  %v703_v17 = vld [vmem:[#allocation4 + $0x20] sm:$0xf]  ;;  %v628_v19 = vor.u32 %v877_v6, %v625_v9 }
  0x21   :  { %177 = vmatpush.bf16.msra.mxu0 %v648_v38  ;;  %415 = vmatpush.bf16.msra.mxu3 %v792_v53  ;;  %v809_v13 = vld [vmem:[#allocation4 + $0xf8] sm:$0xf0]  ;;  %v898_v18 = vld [vmem:[#allocation4 + $0x24] sm:$0xf0]  ;;  %v748_v20 = vor.u32 %v907_v10, %v745_v11  ;;  %v767_v21 = vld [vmem:[#allocation4 + $0xa0] sm:$0xf] }
  0x22   :  { %190 = vmatpush.bf16.msra.mxu1 %v652_v43  ;;  %v914_v22 = vld [vmem:[#allocation4 + $0xa4] sm:$0xf0]  ;;  %v812_v23 = vor.u32 %v923_v12, %v809_v13  ;;  %v905_v24 = vld [vmem:[#allocation4 + $0x64] sm:$0xf]  ;;  %v737_v25 = vld [vmem:[#allocation4 + $0x68] sm:$0xf0]  ;;  %v704_v28 = vor.u32 %v898_v18, %v703_v17 }
  0x23   :  { %403 = vmatpush.bf16.msra.mxu2 %v720_v63  ;;  %v921_v26 = vld [vmem:[#allocation4 + $0xe4] sm:$0xf]  ;;  %v801_v27 = vld [vmem:[#allocation4 + $0xe8] sm:$0xf0]  ;;  %v71_v29 = vld [vmem:[%s1088_s0] sm:$0xf]  ;;  %v768_v30 = vor.u32 %v914_v22, %v767_v21  ;;  %v740_v31 = vor.u32 %v905_v24, %v737_v25 }
  0x24   :  { %v804_v32 = vor.u32 %v921_v26, %v801_v27  ;;  %v903_v33 = vld [vmem:[#allocation4 + $0x54] sm:$0xf]  ;;  %v729_v34 = vld [vmem:[#allocation4 + $0x58] sm:$0xf0]  ;;  %v901_v39 = vld [vmem:[#allocation4 + $0x44] sm:$0xf] }
  0x25   :  { %178 = vmatpush.bf16.msra.mxu0 %v640_v51  ;;  %416 = vmatpush.bf16.msra.mxu3 %v784_v2  ;;  %v919_v35 = vld [vmem:[#allocation4 + $0xd4] sm:$0xf]  ;;  %v793_v36 = vld [vmem:[#allocation4 + $0xd8] sm:$0xf0]  ;;  %v732_v37 = vor.u32 %v903_v33, %v729_v34  ;;  %v721_v40 = vld [vmem:[#allocation4 + $0x48] sm:$0xf0] }
  0x26   :  { %191 = vmatpush.bf16.msra.mxu1 %v644_v56  ;;  %v796_v38 = vor.u32 %v919_v35, %v793_v36  ;;  %v917_v41 = vld [vmem:[#allocation4 + $0xc4] sm:$0xf]  ;;  %v785_v42 = vld [vmem:[#allocation4 + $0xc8] sm:$0xf0]  ;;  %v724_v43 = vor.u32 %v901_v39, %v721_v40  ;;  %v899_v45 = vld [vmem:[#allocation4 + $0x34] sm:$0xf] }
  0x27   :  { %404 = vmatpush.bf16.msra.mxu2 %v712_v14  ;;  %v788_v44 = vor.u32 %v917_v41, %v785_v42  ;;  %v713_v46 = vld [vmem:[#allocation4 + $0x38] sm:$0xf0]  ;;  %v915_v47 = vld [vmem:[#allocation4 + $0xb4] sm:$0xf]  ;;  %v897_v51 = vld [vmem:[#allocation4 + $0x24] sm:$0xf] }
  0x28   :  { %v777_v48 = vld [vmem:[#allocation4 + $0xb8] sm:$0xf0]  ;;  %v716_v49 = vor.u32 %v899_v45, %v713_v46  ;;  %v705_v52 = vld [vmem:[#allocation4 + $0x28] sm:$0xf0]  ;;  %v913_v53 = vld [vmem:[#allocation4 + $0xa4] sm:$0xf] }
  0x29   :  { %179 = vmatpush.bf16.msra.mxu0 %v632_v0  ;;  %417 = vmatpush.bf16.msra.mxu3 %v776_v16  ;;  %v780_v50 = vor.u32 %v915_v47, %v777_v48  ;;  %v769_v54 = vld [vmem:[#allocation4 + $0xa8] sm:$0xf0]  ;;  %v708_v55 = vor.u32 %v897_v51, %v705_v52  ;;  %v695_v57 = vld [vmem:[#allocation4 + $0x10] sm:$0xf]  ;;  %v896_v58 = vld [vmem:[#allocation4 + $0x14] sm:$0xf0] }
  0x2a   :  { %192 = vmatpush.bf16.msra.mxu1 %v636_v5  ;;  %v772_v56 = vor.u32 %v913_v53, %v769_v54  ;;  %v759_v59 = vld [vmem:[#allocation4 + $0x90] sm:$0xf]  ;;  %v696_v60 = vor.u32 %v896_v58, %v695_v57  ;;  %v912_v61 = vld [vmem:[#allocation4 + $0x94] sm:$0xf0]  ;;  %v895_v62 = vld [vmem:[#allocation4 + $0x14] sm:$0xf] }
  0x2b   :  { %405 = vmatpush.bf16.msra.mxu2 %v704_v28  ;;  %v697_v63 = vld [vmem:[#allocation4 + $0x18] sm:$0xf0]  ;;  %v760_v0 = vor.u32 %v912_v61, %v759_v59  ;;  %v911_v2 = vld [vmem:[#allocation4 + $0x94] sm:$0xf]  ;;  %v687_v5 = vld [vmem:[#allocation4] sm:$0xf] }
  0x2c   :  { %v700_v1 = vor.u32 %v895_v62, %v697_v63  ;;  %v761_v3 = vld [vmem:[#allocation4 + $0x98] sm:$0xf0]  ;;  %v894_v6 = vld [vmem:[#allocation4 + $0x4] sm:$0xf0]  ;;  %v751_v7 = vld [vmem:[#allocation4 + $0x80] sm:$0xf] }
  0x2d   :  { %180 = vmatpush.bf16.msra.mxu0 %v624_v15  ;;  %418 = vmatpush.bf16.msra.mxu3 %v768_v30  ;;  %v764_v4 = vor.u32 %v911_v2, %v761_v3  ;;  %v688_v8 = vor.u32 %v894_v6, %v687_v5  ;;  %v910_v9 = vld [vmem:[#allocation4 + $0x84] sm:$0xf0]  ;;  %v893_v10 = vld [vmem:[#allocation4 + $0x4] sm:$0xf]  ;;  %v689_v11 = vld [vmem:[#allocation4 + $0x8] sm:$0xf0] }
  0x2e   :  { %193 = vmatpush.bf16.msra.mxu1 %v628_v19  ;;  %v752_v12 = vor.u32 %v910_v9, %v751_v7  ;;  %v692_v13 = vor.u32 %v893_v10, %v689_v11  ;;  %v909_v14 = vld [vmem:[#allocation4 + $0x84] sm:$0xf]  ;;  %v753_v15 = vld [vmem:[#allocation4 + $0x88] sm:$0xf0]  ;;  %v940_v17 = vld [vmem:[#allocation6 + $0x78] sm:$0xff] }
  0x2f   :  { %406 = vmatpush.bf16.msra.mxu2 %v696_v60  ;;  %v756_v16 = vor.u32 %v909_v14, %v753_v15  ;;  %v932_v18 = vld [vmem:[#allocation6 + $0x38] sm:$0xff]  ;;  %v939_v19 = vld [vmem:[#allocation6 + $0x70] sm:$0xff]  ;;  %v938_v21 = vld [vmem:[#allocation6 + $0x68] sm:$0xff] }
  0x30   :  { %181 = vmatmul.bf16.vlgmr.msra.gmra.mxu0 %v71_v29  ;;  %v930_v22 = vld [vmem:[#allocation6 + $0x28] sm:$0xff]  ;;  %v929_v24 = vld [vmem:[#allocation6 + $0x20] sm:$0xff]  ;;  %v936_v25 = vld [vmem:[#allocation6 + $0x58] sm:$0xff] }
  0x31   :  { %426 = vmatpush.bf16.msrb.mxu0 %v748_v20  ;;  %194 = vmatmul.bf16.vlgmr.msra.gmra.mxu1 %v71_v29  ;;  %v931_v20 = vld [vmem:[#allocation6 + $0x30] sm:$0xff]  ;;  %v67_v26 = vld [vmem:[%s1092_s4] ss:$4 sm:$0x3]  ;;  %v928_v40 = vld [vmem:[#allocation6 + $0x18] sm:$0xff] }
  0x32   :  { %439 = vmatpush.bf16.msrb.mxu1 %v812_v23  ;;  %419 = vmatpush.bf16.msra.mxu3 %v760_v0  ;;  %v937_v23 = vld [vmem:[#allocation6 + $0x60] sm:$0xff]  ;;  %v935_v27 = vld [vmem:[#allocation6 + $0x50] sm:$0xff]  ;;  %v89_v28 = vperm.slane %v67_v26, 0  ;;  %v90_v29 = vperm.slane %v67_v26, 1  ;;  %v934_v41 = vld [vmem:[#allocation6 + $0x48] sm:$0xff] }
  0x33   :  { %407 = vmatpush.bf16.msra.mxu2 %v688_v8  ;;  %v927_v42 = vld [vmem:[#allocation6 + $0x10] sm:$0xff]  ;;  %v925_v45 = vld [vmem:[#allocation6] sm:$0xff] }
  0x34   :  { %v620_v46 = vld [vmem:[%s1092_s4 + $0x1] ss:$4 sm:$0x3]  ;;  %v948_v2 = vld [vmem:[%s1092_s4 + $0x2] ss:$0 sm:$0xff] }
  0x35   :  { %427 = vmatpush.bf16.msrb.mxu0 %v740_v31  ;;  %v237_v47 = vperm.slane %v620_v46, 1  ;;  %v236_v52 = vperm.slane %v620_v46, 0 }
  0x36   :  { %440 = vmatpush.bf16.msrb.mxu1 %v804_v32  ;;  %420 = vmatpush.bf16.msra.mxu3 %v752_v12 }
  0x37   :  { %585 = vmatpush.bf16.msrb.mxu2 %v932_v18 }
  0x39   :  { %428 = vmatpush.bf16.msrb.mxu0 %v732_v37 }
  0x3a   :  { %441 = vmatpush.bf16.msrb.mxu1 %v796_v38  ;;  %598 = vmatpush.bf16.msrb.mxu3 %v940_v17 }
  0x3b   :  { %586 = vmatpush.bf16.msrb.mxu2 %v931_v20 }
  0x3d   :  { %429 = vmatpush.bf16.msrb.mxu0 %v724_v43  ;;  %v933_v43 = vld [vmem:[#allocation6 + $0x40] sm:$0xff] }
  0x3e   :  { %442 = vmatpush.bf16.msrb.mxu1 %v788_v44  ;;  %599 = vmatpush.bf16.msrb.mxu3 %v939_v19  ;;  %v926_v44 = vld [vmem:[#allocation6 + $0x8] sm:$0xff] }
  0x3f   :  { %587 = vmatpush.bf16.msrb.mxu2 %v930_v22 }
  0x41   :  { %430 = vmatpush.bf16.msrb.mxu0 %v716_v49 }
  0x42   :  { %443 = vmatpush.bf16.msrb.mxu1 %v780_v50  ;;  %600 = vmatpush.bf16.msrb.mxu3 %v938_v21 }
  0x43   :  { %588 = vmatpush.bf16.msrb.mxu2 %v929_v24 }
  0x45   :  { %431 = vmatpush.bf16.msrb.mxu0 %v708_v55 }
  0x46   :  { %444 = vmatpush.bf16.msrb.mxu1 %v772_v56  ;;  %601 = vmatpush.bf16.msrb.mxu3 %v937_v23 }
  0x47   :  { %589 = vmatpush.bf16.msrb.mxu2 %v928_v40 }
  0x49   :  { %432 = vmatpush.bf16.msrb.mxu0 %v700_v1 }
  0x4a   :  { %445 = vmatpush.bf16.msrb.mxu1 %v764_v4  ;;  %602 = vmatpush.bf16.msrb.mxu3 %v936_v25 }
  0x4b   :  { %590 = vmatpush.bf16.msrb.mxu2 %v927_v42 }
  0x4d   :  { %433 = vmatpush.bf16.msrb.mxu0 %v692_v13 }
  0x4e   :  { %446 = vmatpush.bf16.msrb.mxu1 %v756_v16  ;;  %603 = vmatpush.bf16.msrb.mxu3 %v935_v27 }
  0x4f   :  { %591 = vmatpush.bf16.msrb.mxu2 %v926_v44 }
  0x52   :  { %604 = vmatpush.bf16.msrb.mxu3 %v934_v41 }
  0x53   :  { %592 = vmatpush.bf16.msrb.mxu2 %v925_v45 }
  0x56   :  { %605 = vmatpush.bf16.msrb.mxu3 %v933_v43 }
  0xad   :  { %v182_v30 = vpop.f32.mrf.mxu0 }
  0xae   :  { %v183_v31 = vadd.f32 %v182_v30, %v89_v28  ;;  %v195_v32 = vpop.f32.mrf.mxu1 }
  0xaf   :  { %v196_v33 = vadd.f32 %v195_v32, %v90_v29 }
  0xb0   :  { %v199_v34 = vmax.f32 %v183_v31, 0.0 }
  0xb1   :  { %v200_v35 = vmax.f32 %v196_v33, 0.0 }
  0xb2   :  { %v201_v36 = vpack.c.bf16 %v199_v34, %v199_v34 }
  0xb3   :  { %v202_v37 = vpack.c.bf16 %v200_v35, %v200_v35 }
  0xb4   :  { %408 = vmatmul.bf16.vlgmr.msra.gmra.mxu2 %v201_v36  ;;  %434 = vmatmul.bf16.vlgmr.msrb.gmra.mxu0 %v201_v36 }
  0xb5   :  { %421 = vmatmul.bf16.vlgmr.msra.gmra.mxu3 %v202_v37  ;;  %447 = vmatmul.bf16.vlgmr.msrb.gmra.mxu1 %v202_v37  ;;  %v184_v38 = vpop.f32.mrf.mxu0 }
  0xb6   :  { %v197_v39 = vpop.f32.mrf.mxu1 }
 0x131   :  { %v435_v48 = vpop.f32.mrf.mxu0 }
 0x132   :  { %v436_v49 = vadd.f32 %v435_v48, %v237_v47  ;;  %v448_v50 = vpop.f32.mrf.mxu1 }
 0x134   :  { %v449_v51 = vadd.f32 %v448_v50, %v436_v49 }
 0x136   :  { %v453_v53 = vmax.f32 %v449_v51, 0.0 }
 0x137   :  { %v409_v54 = vpop.f32.mrf.mxu2 }
 0x138   :  { %v455_v55 = vpack.c.bf16 %v453_v53, %v453_v53  ;;  %v410_v56 = vadd.f32 %v409_v54, %v236_v52  ;;  %v422_v57 = vpop.f32.mrf.mxu3 }
 0x139   :  { %v437_v58 = vpop.f32.mrf.mxu0 }
 0x13a   :  { %v423_v59 = vadd.f32 %v422_v57, %v410_v56  ;;  %v450_v60 = vpop.f32.mrf.mxu1  ;;  %606 = vmatmul.bf16.vlgmr.msrb.gmra.mxu3 %v455_v55 }
 0x13c   :  { %v452_v61 = vmax.f32 %v423_v59, 0.0 }
 0x13e   :  { %v454_v62 = vpack.c.bf16 %v452_v61, %v452_v61 }
 0x13f   :  { %v411_v63 = vpop.f32.mrf.mxu2 }
 0x140   :  { %v424_v0 = vpop.f32.mrf.mxu3  ;;  %593 = vmatmul.bf16.vlgmr.msrb.gmra.mxu2 %v454_v62 }
 0x1bd   :  { %v607_v1 = vpop.f32.mrf.mxu3 }
 0x1c3   :  { %v594_v3 = vpop.f32.mrf.mxu2 }
 0x1c4   :  { %v595_v4 = vadd.f32 %v948_v2, %v594_v3 }
 0x1c5   :  { %v609_v5 = vpop.f32.mrf.mxu3 }
 0x1c6   :  { %v608_v6 = vadd.f32 %v607_v1, %v595_v4 }
 0x1c8   :  { %949 = vtanh.f32 %v608_v6 }
 0x1cb   :  { %v596_v7 = vpop.f32.mrf.mxu2 }
 0x1ce   :  { %v950_v8 = vpop.eup %949 }
 0x1cf   :  { %v612_v9 = vpack.c.bf16 %v950_v8, %v950_v8 }
 0x1d1   :  { %613 = vst [vmem:[%s1093_s5] sm:$0xf] %v612_v9 }
 0x1d2   :  { %618 = vsyncpa [#allocation3], 1 }
 0x1d3   :  { %619 = vsyncpa [#allocation5], 1 }

</bundles_post_ra>
